<compile_context>
chip_gen: v7x
topology: tpu7x:2x2x1
jax: 0.10.0
libtpu: 0.0.40
codegen_flags: <defaults>
</compile_context>

<pallas_src>
import jax
import jax.numpy as jnp
from jax import lax
from jax.experimental import pallas as pl
from jax.experimental.pallas import tpu as pltpu


# ----------------------------------------------------------------------------
# Fused Pallas kernel: both ResizeCell0 paths for one batch sample
# ----------------------------------------------------------------------------

def _resize_cell0_kernel(x_ref, h_ref, wx_ref, bx_ref, pmat_ref, wh_ref, bh_ref,
                         ox_ref, oh_ref):
    # ---- right / x path: relu -> 1x1 conv (BN scale folded into wx) -> +bias ----
    xr = jnp.maximum(x_ref[0], 0.0)                                       # (Cx, Hx*Wx) f32
    yx = jnp.dot(wx_ref[...], xr, preferred_element_type=jnp.float32)     # (Cout, Hx*Wx)
    ox_ref[0] = yx + bx_ref[...]                                          # lane-dense store

    # ---- left / h path: relu -> AvgPool2d(3,2,1) as matmul -> 1x1 conv -> +bias ----
    hr = jnp.maximum(h_ref[0], 0.0)                                       # (Ch, Hh*Wh) f32
    # pmat is the constant 0/1 pooling operator; 1/9 and BN scale are folded into wh.
    pooled = jnp.dot(hr, pmat_ref[...], preferred_element_type=jnp.float32)   # (Ch, Ho*Wo)
    yh = jnp.dot(wh_ref[...], pooled, preferred_element_type=jnp.float32)     # (Cout, Ho*Wo)
    oh_ref[0] = yh + bh_ref[...]                                          # lane-dense store


# ----------------------------------------------------------------------------
# Wrapper: free reshapes only (stays NCHW / channels-first) + one pallas_call
# ----------------------------------------------------------------------------

@jax.jit
def resize_cell0(params, pool_mat, x, h):
    N, Cx, Hx, Wx = x.shape
    Nh, Ch, Hh, Wh = h.shape
    assert N == Nh
    Ho = (Hh - 1) // 2 + 1           # PyTorch AvgPool2d(3, stride=2, padding=1) output size
    Wo = (Wh - 1) // 2 + 1
    HWx, HWh, HWo = Hx * Wx, Hh * Wh, Ho * Wo
    Cout = params["wx"].shape[0]
    assert pool_mat.shape == (HWh, HWo)

    # Free minor-dim-merging reshapes; data stays channels-first in HBM, no extra passes.
    x2 = x.reshape(N, Cx, HWx)
    h2 = h.reshape(N, Ch, HWh)

    ox, oh = pl.pallas_call(
        _resize_cell0_kernel,
        grid=(N,),
        in_specs=[
            pl.BlockSpec((1, Cx, HWx), lambda n: (n, 0, 0)),    # x sample
            pl.BlockSpec((1, Ch, HWh), lambda n: (n, 0, 0)),    # h sample
            pl.BlockSpec((Cout, Cx), lambda n: (0, 0)),         # wx  (BN scale folded)
            pl.BlockSpec((Cout, 1), lambda n: (0, 0)),          # bx
            pl.BlockSpec((HWh, HWo), lambda n: (0, 0)),         # pooling operator (const)
            pl.BlockSpec((Cout, Ch), lambda n: (0, 0)),         # wh  (BN scale & 1/9 folded)
            pl.BlockSpec((Cout, 1), lambda n: (0, 0)),          # bh
        ],
        out_specs=(
            pl.BlockSpec((1, Cout, HWx), lambda n: (n, 0, 0)),
            pl.BlockSpec((1, Cout, HWo), lambda n: (n, 0, 0)),
        ),
        out_shape=(
            jax.ShapeDtypeStruct((N, Cout, HWx), jnp.float32),
            jax.ShapeDtypeStruct((N, Cout, HWo), jnp.float32),
        ),
        compiler_params=pltpu.CompilerParams(dimension_semantics=("parallel",)),
    )(x2, h2, params["wx"], params["bx"], pool_mat, params["wh"], params["bh"])

    # Both outputs are already NCHW -> free reshapes, no transpose.
    return ox.reshape(N, Cout, Hx, Wx), oh.reshape(N, Cout, Ho, Wo)


# ----------------------------------------------------------------------------
# Constant pooling operator: AvgPool2d(3, stride=2, padding=1) window-sum as a matmul
# ----------------------------------------------------------------------------

def make_pool_matrix(hh, wh):
    """P[(r*wh + c), (i*wo + j)] = 1 iff input pixel (r,c) lies in the 3x3/stride-2
    window of output pixel (i,j) (top/left zero padding handled by the bounds)."""
    ho = (hh - 1) // 2 + 1
    wo = (wh - 1) // 2 + 1
    rows = jnp.arange(hh, dtype=jnp.int32)
    cols = jnp.arange(wh, dtype=jnp.int32)
    oi = jnp.arange(ho, dtype=jnp.int32)
    oj = jnp.arange(wo, dtype=jnp.int32)
    ah = (jnp.abs(rows[:, None] - 2 * oi[None, :]) <= 1).astype(jnp.float32)   # (hh, ho)
    aw = (jnp.abs(cols[:, None] - 2 * oj[None, :]) <= 1).astype(jnp.float32)   # (wh, wo)
    p = (ah[:, None, :, None] * aw[None, :, None, :]).reshape(hh * wh, ho * wo)
    return p


# ----------------------------------------------------------------------------
# Deterministic synthetic parameters (inference-folded BatchNorm, eps=1e-3)
# ----------------------------------------------------------------------------

def _fold_bn(gamma, beta, mean, var, eps=1e-3):
    scale = gamma / jnp.sqrt(var + eps)
    bias = beta - mean * scale
    return scale.astype(jnp.float32), bias.astype(jnp.float32)


def _init_bn(key, c):
    k1, k2, k3, k4 = jax.random.split(key, 4)
    gamma = 1.0 + 0.1 * jax.random.normal(k1, (c,), jnp.float32)
    beta = 0.1 * jax.random.normal(k2, (c,), jnp.float32)
    mean = 0.1 * jax.random.normal(k3, (c,), jnp.float32)
    var = 0.5 + 0.1 * jnp.abs(jax.random.normal(k4, (c,), jnp.float32))
    return _fold_bn(gamma, beta, mean, var)


def init_resize_cell0(key, cin_x, cin_h, cout):
    assert cout % 2 == 0
    ks = jax.random.split(key, 5)
    w_right = 0.1 * jax.random.normal(ks[0], (cout, cin_x), jnp.float32)       # conv_right
    w_left0 = 0.1 * jax.random.normal(ks[1], (cout // 2, cin_h), jnp.float32)  # conv_left_0
    w_left1 = 0.1 * jax.random.normal(ks[2], (cout // 2, cin_h), jnp.float32)  # conv_left_1
    sx, bx = _init_bn(ks[3], cout)   # bn_right
    sh, bh = _init_bn(ks[4], cout)   # bn_left
    # torch.cat([h_0, h_1], dim=1): first cout//2 output channels from conv_left_0.
    w_left = jnp.concatenate([w_left0, w_left1], axis=0)                       # (cout, cin_h)
    kernel_params = dict(
        wx=(w_right * sx[:, None]).astype(jnp.float32),         # BN scale folded
        bx=bx.reshape(cout, 1),
        wh=(w_left * (sh[:, None] / 9.0)).astype(jnp.float32),  # BN scale + 1/9 folded
        bh=bh.reshape(cout, 1),
    )
    ref_params = dict(w_right=w_right, w_left=w_left, sx=sx, bx=bx, sh=sh, bh=bh)
    return kernel_params, ref_params


# ----------------------------------------------------------------------------

if __name__ == "__main__":
    key = jax.random.PRNGKey(0)
    kx, kh, kp = jax.random.split(key, 3)

    N, Cx, Ch, Cout = 2, 8, 8, 16
    Hx = Wx = 16          # x-path spatial
    Hh = Wh = 32          # h-path spatial (pooled by stride 2 down to 16x16)

    x = jax.random.normal(kx, (N, Cx, Hx, Wx), jnp.float32)   # NCHW like PyTorch
    h = jax.random.normal(kh, (N, Ch, Hh, Wh), jnp.float32)
    params, ref_params = init_resize_cell0(kp, Cx, Ch, Cout)
    pool_mat = make_pool_matrix(Hh, Wh)

    x_out, h_out = resize_cell0(params, pool_mat, x, h)
    x_out, h_out = jax.block_until_ready((x_out, h_out))

    # ---- pure-XLA reference (PyTorch-faithful: f32 convs, folded inference BN) ----
    wx_raw = ref_params["w_right"]        # (Cout, Cx)
    wl_raw = ref_params["w_left"]         # (Cout, Ch)
    sx, bxv = ref_params["sx"], ref_params["bx"]
    sh, bhv = ref_params["sh"], ref_params["bh"]

    x_ref = jnp.einsum("nchw,oc->nohw", jnp.maximum(x, 0.0), wx_raw)
    x_ref = x_ref * sx.reshape(1, -1, 1, 1) + bxv.reshape(1, -1, 1, 1)

    pooled = lax.reduce_window(jnp.maximum(h, 0.0), 0.0, lax.add,
                               (1, 1, 3, 3), (1, 1, 2, 2),
                               ((0, 0), (0, 0), (1, 1), (1, 1))) / 9.0
    h_ref = jnp.einsum("nchw,oc->nohw", pooled, wl_raw)
    h_ref = h_ref * sh.reshape(1, -1, 1, 1) + bhv.reshape(1, -1, 1, 1)

    assert x_out.shape == (N, Cout, Hx, Wx), x_out.shape
    assert h_out.shape == (N, Cout, Hh // 2, Wh // 2), h_out.shape
    assert bool(jnp.all(jnp.isfinite(x_out))) and bool(jnp.all(jnp.isfinite(h_out)))
    err_x = float(jnp.max(jnp.abs(x_out - x_ref)))
    err_h = float(jnp.max(jnp.abs(h_out - h_ref)))
    assert bool(jnp.allclose(x_out, x_ref, atol=5e-3, rtol=5e-3)), err_x
    assert bool(jnp.allclose(h_out, h_ref, atol=5e-3, rtol=5e-3)), err_h
    print("KERNEL_OK")
</pallas_src>

<mosaic_0001>
module attributes {stable_mosaic.version = 11 : i64} {
  func.func @_resize_cell0_kernel(%arg0: i32, %arg1: memref<1x8x256xf32, #tpu.memory_space<vmem>>, %arg2: memref<1x8x1024xf32, #tpu.memory_space<vmem>>, %arg3: memref<16x8xf32, #tpu.memory_space<vmem>>, %arg4: memref<16x1xf32, #tpu.memory_space<vmem>>, %arg5: memref<1024x256xf32, #tpu.memory_space<vmem>>, %arg6: memref<16x8xf32, #tpu.memory_space<vmem>>, %arg7: memref<16x1xf32, #tpu.memory_space<vmem>>, %arg8: memref<1x16x256xf32, #tpu.memory_space<vmem>>, %arg9: memref<1x16x256xf32, #tpu.memory_space<vmem>>) attributes {dimension_semantics = [#tpu.dimension_semantics<parallel>], iteration_bounds = array<i64: 2>, scalar_prefetch = 0 : i64, scratch_operands = 0 : i64, tpu.core_type = #tpu.core_type<tc>, window_params = [{transform_indices = @transform_0, window_bounds = array<i64: 1, 8, 256>}, {transform_indices = @transform_1, window_bounds = array<i64: 1, 8, 1024>}, {pipeline_mode = #tpu.pipeline_mode<synchronous>, transform_indices = @transform_2, window_bounds = array<i64: 16, 8>}, {pipeline_mode = #tpu.pipeline_mode<synchronous>, transform_indices = @transform_3, window_bounds = array<i64: 16, 1>}, {pipeline_mode = #tpu.pipeline_mode<synchronous>, transform_indices = @transform_4, window_bounds = array<i64: 1024, 256>}, {pipeline_mode = #tpu.pipeline_mode<synchronous>, transform_indices = @transform_5, window_bounds = array<i64: 16, 8>}, {pipeline_mode = #tpu.pipeline_mode<synchronous>, transform_indices = @transform_6, window_bounds = array<i64: 16, 1>}, {transform_indices = @transform_7, window_bounds = array<i64: 1, 16, 256>}, {transform_indices = @transform_8, window_bounds = array<i64: 1, 16, 256>}]} {
    %c0 = arith.constant 0 : index
    %c0_0 = arith.constant 0 : index
    %c0_1 = arith.constant 0 : index
    %0 = vector.load %arg1[%c0, %c0_0, %c0_1] : memref<1x8x256xf32, #tpu.memory_space<vmem>>, vector<1x8x256xf32>
    %1 = vector.shape_cast %0 : vector<1x8x256xf32> to vector<8x256xf32>
    %cst = arith.constant 0.000000e+00 : f32
    %2 = vector.broadcast %cst : f32 to vector<8x256xf32>
    %3 = arith.maximumf %1, %2 : vector<8x256xf32>
    %c0_2 = arith.constant 0 : index
    %c0_3 = arith.constant 0 : index
    %4 = vector.load %arg3[%c0_2, %c0_3] : memref<16x8xf32, #tpu.memory_space<vmem>>, vector<16x8xf32>
    %cst_4 = arith.constant dense<0.000000e+00> : vector<16x256xf32>
    %5 = tpu.matmul %4, %3, %cst_4 {dimension_numbers = #tpu.dot_dimension_numbers<[1], [0], [0], [1], [0, 0, 1, 1], [], []>} : vector<16x8xf32>, vector<8x256xf32>, vector<16x256xf32> -> vector<16x256xf32>
    %c0_5 = arith.constant 0 : index
    %c0_6 = arith.constant 0 : index
    %6 = vector.load %arg4[%c0_5, %c0_6] : memref<16x1xf32, #tpu.memory_space<vmem>>, vector<16x1xf32>
    %7 = vector.broadcast %6 : vector<16x1xf32> to vector<16x256xf32>
    %8 = arith.addf %5, %7 : vector<16x256xf32>
    %c0_7 = arith.constant 0 : index
    %c0_8 = arith.constant 0 : index
    %c0_9 = arith.constant 0 : index
    %9 = vector.load %arg8[%c0_7, %c0_8, %c0_9] : memref<1x16x256xf32, #tpu.memory_space<vmem>>, vector<1x16x256xf32>
    %10 = vector.shape_cast %9 : vector<1x16x256xf32> to vector<16x256xf32>
    %11 = vector.shape_cast %8 : vector<16x256xf32> to vector<1x16x256xf32>
    tpu.vector_store %arg8[%c0_7, %c0_8, %c0_9], %11 {strides = array<i32>} : memref<1x16x256xf32, #tpu.memory_space<vmem>>, vector<1x16x256xf32>,
    %c0_10 = arith.constant 0 : index
    %c0_11 = arith.constant 0 : index
    %c0_12 = arith.constant 0 : index
    %12 = vector.load %arg2[%c0_10, %c0_11, %c0_12] : memref<1x8x1024xf32, #tpu.memory_space<vmem>>, vector<1x8x1024xf32>
    %13 = vector.shape_cast %12 : vector<1x8x1024xf32> to vector<8x1024xf32>
    %cst_13 = arith.constant 0.000000e+00 : f32
    %14 = vector.broadcast %cst_13 : f32 to vector<8x1024xf32>
    %15 = arith.maximumf %13, %14 : vector<8x1024xf32>
    %c0_14 = arith.constant 0 : index
    %c0_15 = arith.constant 0 : index
    %16 = vector.load %arg5[%c0_14, %c0_15] : memref<1024x256xf32, #tpu.memory_space<vmem>>, vector<1024x256xf32>
    %cst_16 = arith.constant dense<0.000000e+00> : vector<8x256xf32>
    %17 = tpu.matmul %15, %16, %cst_16 {dimension_numbers = #tpu.dot_dimension_numbers<[1], [0], [0], [1], [0, 0, 1, 1], [], []>} : vector<8x1024xf32>, vector<1024x256xf32>, vector<8x256xf32> -> vector<8x256xf32>
    %c0_17 = arith.constant 0 : index
    %c0_18 = arith.constant 0 : index
    %18 = vector.load %arg6[%c0_17, %c0_18] : memref<16x8xf32, #tpu.memory_space<vmem>>, vector<16x8xf32>
    %cst_19 = arith.constant dense<0.000000e+00> : vector<16x256xf32>
    %19 = tpu.matmul %18, %17, %cst_19 {dimension_numbers = #tpu.dot_dimension_numbers<[1], [0], [0], [1], [0, 0, 1, 1], [], []>} : vector<16x8xf32>, vector<8x256xf32>, vector<16x256xf32> -> vector<16x256xf32>
    %c0_20 = arith.constant 0 : index
    %c0_21 = arith.constant 0 : index
    %20 = vector.load %arg7[%c0_20, %c0_21] : memref<16x1xf32, #tpu.memory_space<vmem>>, vector<16x1xf32>
    %21 = vector.broadcast %20 : vector<16x1xf32> to vector<16x256xf32>
    %22 = arith.addf %19, %21 : vector<16x256xf32>
    %c0_22 = arith.constant 0 : index
    %c0_23 = arith.constant 0 : index
    %c0_24 = arith.constant 0 : index
    %23 = vector.load %arg9[%c0_22, %c0_23, %c0_24] : memref<1x16x256xf32, #tpu.memory_space<vmem>>, vector<1x16x256xf32>
    %24 = vector.shape_cast %23 : vector<1x16x256xf32> to vector<16x256xf32>
    %25 = vector.shape_cast %22 : vector<16x256xf32> to vector<1x16x256xf32>
    tpu.vector_store %arg9[%c0_22, %c0_23, %c0_24], %25 {strides = array<i32>} : memref<1x16x256xf32, #tpu.memory_space<vmem>>, vector<1x16x256xf32>,
    return
  }
  func.func @transform_0(%arg0: i32) -> (i32, i32, i32) {
    %c0_i32 = arith.constant 0 : i32
    %c0_i32_0 = arith.constant 0 : i32
    %c0_i32_1 = arith.constant 0 : i32
    return %arg0, %c0_i32, %c0_i32_0 : i32, i32, i32
  }
  func.func @transform_1(%arg0: i32) -> (i32, i32, i32) {
    %c0_i32 = arith.constant 0 : i32
    %c0_i32_0 = arith.constant 0 : i32
    %c0_i32_1 = arith.constant 0 : i32
    return %arg0, %c0_i32, %c0_i32_0 : i32, i32, i32
  }
  func.func @transform_2(%arg0: i32) -> (i32, i32) {
    %c0_i32 = arith.constant 0 : i32
    %c0_i32_0 = arith.constant 0 : i32
    %c0_i32_1 = arith.constant 0 : i32
    return %c0_i32, %c0_i32_0 : i32, i32
  }
  func.func @transform_3(%arg0: i32) -> (i32, i32) {
    %c0_i32 = arith.constant 0 : i32
    %c0_i32_0 = arith.constant 0 : i32
    %c0_i32_1 = arith.constant 0 : i32
    return %c0_i32, %c0_i32_0 : i32, i32
  }
  func.func @transform_4(%arg0: i32) -> (i32, i32) {
    %c0_i32 = arith.constant 0 : i32
    %c0_i32_0 = arith.constant 0 : i32
    %c0_i32_1 = arith.constant 0 : i32
    return %c0_i32, %c0_i32_0 : i32, i32
  }
  func.func @transform_5(%arg0: i32) -> (i32, i32) {
    %c0_i32 = arith.constant 0 : i32
    %c0_i32_0 = arith.constant 0 : i32
    %c0_i32_1 = arith.constant 0 : i32
    return %c0_i32, %c0_i32_0 : i32, i32
  }
  func.func @transform_6(%arg0: i32) -> (i32, i32) {
    %c0_i32 = arith.constant 0 : i32
    %c0_i32_0 = arith.constant 0 : i32
    %c0_i32_1 = arith.constant 0 : i32
    return %c0_i32, %c0_i32_0 : i32, i32
  }
  func.func @transform_7(%arg0: i32) -> (i32, i32, i32) {
    %c0_i32 = arith.constant 0 : i32
    %c0_i32_0 = arith.constant 0 : i32
    %c0_i32_1 = arith.constant 0 : i32
    return %arg0, %c0_i32, %c0_i32_0 : i32, i32, i32
  }
  func.func @transform_8(%arg0: i32) -> (i32, i32, i32) {
    %c0_i32 = arith.constant 0 : i32
    %c0_i32_0 = arith.constant 0 : i32
    %c0_i32_1 = arith.constant 0 : i32
    return %arg0, %c0_i32, %c0_i32_0 : i32, i32, i32
  }
}

</mosaic_0001>

<bundles_post_ra>
// kernel: resize_cell0.1
= control target key start
LH: loop header
LB: loop body
LE: loop exit
PB: predicated region body
PF: predicated region fallthrough
CT: control target
= control target key end

     0   :  { %14 = vsyncpa [#allocation3], 0  ;;  %s1633_s27 = smov 0   ;;  %s1746_s0 = inlined_call_operand.vmem [shape: f32[2,8,256], index: 0, kind: input, shape index: {}]   ;;  %s1747_s1 = inlined_call_operand.vmem [shape: f32[2,8,1024], index: 1, kind: input, shape index: {}]   ;;  %s1748_s2 = inlined_call_operand.vmem [shape: f32[16,8], index: 2, kind: input, shape index: {}]   ;;  %s1749_s3 = inlined_call_operand.vmem [shape: f32[16,1], index: 3, kind: input, shape index: {}]   ;;  %s1750_s4 = inlined_call_operand.hbm [shape: f32[1024,256], index: 4, kind: input, shape index: {}]   ;;  %s1751_s5 = inlined_call_operand.vmem [shape: f32[16,8], index: 5, kind: input, shape index: {}]   ;;  %s1752_s6 = inlined_call_operand.vmem [shape: f32[16,1], index: 6, kind: input, shape index: {}]   ;;  %s1753_s7 = inlined_call_operand.vmem [shape: f32[2,16,256], index: 7, kind: output, shape index: {0}]   ;;  %s1754_s8 = inlined_call_operand.vmem [shape: f32[2,16,256], index: 8, kind: output, shape index: {1}]  }
   0x1 LB: > { %s1639_s28 = sadd.s32 4294967295, %s1581_s27   ;;  %p1231_p0 = scmp.ge.s32.totalorder %s1581_s27, 1  ;;  %s1581_s27 = sphi %s1633_s27, %s20_s27  }
   0x2   : > { %p234_p1 = scmp.lt.s32.totalorder %s1581_s27, 3  ;;  %s1583_s29 = smov [#allocation2]  }
   0x3   : > { %s252_s30 = sshll.u32 %s1583_s29, 4  ;;  %p1755_p3 = scmp.eq.s32.totalorder %s1639_s28, 0  ;;  %s253_s30 = int_to_ptr.vmem [resolvable:$true] %s252_s30 }
   0x4   : > { %p1643_p2 = pnand %p1231_p0, %p234_p1  ;;  %s1543_s13 = scalar_lea.hbm %s1750_s4, 32768 }
   0x5   : > { %p1544_p6 = scmp.ne.s32.totalorder %s1750_s4, %s1543_s13  ;;  %p1550_p10 = scmp.lt.u32.totalorder %s1543_s13, %s1750_s4 }
   0x6   : > { %s1757_s9 = scalar_select %p1643_p2, 1, 0 }
   0x7   : > { %p1522_p4 = pneg %p1643_p2 }
   0x9   : > { %p1652_p5 = pnand %p1755_p3, %p1522_p4 }
   0xb   : > { %p1545_p7 = pneg %p1652_p5 }
   0xd   : > { %p1546_p8 = pnand %p1545_p7, %p1544_p6 }
   0xf   : > { %p1547_p9 = pneg %p1546_p8 }
  0x11   : > { %p1552_p11 = pnand %p1550_p10, %p1547_p9 }
  0x13   : > { %1555 = shalt.err (!%p1552_p11)
}
  0x14   : > { %s1556_s18 = scalar_lea.vmem %s253_s30, 32768  ;;  %p1564_p1 = scmp.lt.s32.totalorder %s253_s30, %s253_s30 }
  0x15   : > { %p1557_p12 = scmp.ne.s32.totalorder %s253_s30, %s1556_s18  ;;  %p1565_p4 = scmp.lt.s32.totalorder %s1556_s18, %s1556_s18 }
  0x17   : > { %p1559_p13 = pnand %p1557_p12, %p1545_p7  ;;  %p1566_p3 = por %p1565_p4, %p1564_p1 }
  0x19   : > { %p1560_p0 = pneg %p1559_p13 }
  0x1b   : > { %p1567_p2 = pnand %p1566_p3, %p1560_p0 }
  0x1d   : > { %1570 = shalt.err (!%p1567_p2)
}
  0x1e   : > { %s1584_s19 = smov 256   ;;  %s1585_s20 = smov 16  }
  0x1f   : > { %1525 = dma.hbm_to_vmem [thread:$0]  (!%p1652_p5), %s1750_s4, 32768, %s253_s30, [#allocation3], %s1584_s19, %s1584_s19, %s1585_s20  }
  0x20   : > { %p1759_p6 = scmp.ne.s32.totalorder %s1757_s9, 0 }
  0x21   : > { %p1760_p8 = scmp.eq.s32.totalorder (!%p1759_p6), %s1639_s28, 0 }
  0x22   : > { %290 = sbr.rel (%p1759_p6) target bundleno = 613 (0x265), region = 48 }
  0x29   : > { %1576 = dma.done.wait (%p1760_p8), [#allocation3], 32768   ;;  %p1761_p7 = pmov %p1760_p8 }
  0x2a   : > { %p334_p2 = scmp.lt.s32.totalorder %s1639_s28, 1  ;;  %v1586_v0 = vmov 0.0   ;;  %v1587_v1 = vmov 0   ;;  %v605_v3 = vld [vmem:[#allocation2 + $0x408] sm:$0xff]  ;;  %v607_v4 = vld [vmem:[#allocation2 + $0x418] sm:$0xff]  ;;  %v604_v8 = vld [vmem:[#allocation2 + $0x400] sm:$0xff] }
  0x2b   : > { %1578 = vsyncadd (%p1761_p7), [#allocation3], 4294934528  ;;  %443 = vmatprep.mubr.f32.mxu0 %v1586_v0  ;;  %1541 = vset.pattern.permute.xlu0 %v1587_v1  ;;  %v1382_v6 = vpack.c.bf16 %v607_v4, %v605_v3  ;;  %v606_v9 = vld [vmem:[#allocation2 + $0x410] sm:$0xff]  ;;  %v358_v12 = vld [vmem:[%s1748_s2] sm:$0xff]  ;;  %vm372_vm0 = vcmask 64512  }
  0x2c   : > { %s1763_s28 = smov (!%p334_p2, %s1639_s28), 1  ;;  %1542 = vset.pattern.permute.xlu1 %v1587_v1  ;;  %v1384_v11 = vpack.c.bf16 %v606_v9, %v604_v8  ;;  %v477_v13 = vld [vmem:[#allocation2 + $0x8] sm:$0xff]  ;;  %v479_v14 = vld [vmem:[#allocation2 + $0x18] sm:$0xff]  ;;  %v476_v16 = vld [vmem:[#allocation2] sm:$0xff] }
  0x2d   : > { %s1250_s23 = sshll.u32 %s1763_s28, 4  ;;  %1383 = vmatprep.subr.bf16.mxu1 %v1382_v6  ;;  %v1254_v15 = vpack.c.bf16 %v479_v14, %v477_v13  ;;  %v478_v17 = vld [vmem:[#allocation2 + $0x10] sm:$0xff]  ;;  %v609_v18 = vld [vmem:[#allocation2 + $0x428] sm:$0xff]  ;;  %v611_v20 = vld [vmem:[#allocation2 + $0x438] sm:$0xff]  ;;  %s1251_s9 = sshll.u32 %s1763_s28, 6 }
  0x2e   : > { %s338_s26 = scalar_lea.vmem %s1746_s0, %s1250_s23  ;;  %1385 = vmatpush1.bf16.msra.mxu1 %v1384_v11  ;;  %v1256_v19 = vpack.c.bf16 %v478_v17, %v476_v16  ;;  %v608_v21 = vld [vmem:[#allocation2 + $0x420] sm:$0xff]  ;;  %v610_v22 = vld [vmem:[#allocation2 + $0x430] sm:$0xff]  ;;  %v1386_v23 = vpack.c.bf16 %v611_v20, %v609_v18  ;;  %v481_v25 = vld [vmem:[#allocation2 + $0x28] sm:$0xff]  ;;  %s1696_s12 = scalar_lea.vmem %s1747_s1, %s1251_s9 }
  0x2f   : > { %v355_v2 = vld [vmem:[%s338_s26 + $0x8] sm:$0xff]  ;;  %v354_v7 = vld [vmem:[%s338_s26] sm:$0xff]  ;;  %v1388_v24 = vpack.c.bf16 %v610_v22, %v608_v21  ;;  %v483_v26 = vld [vmem:[#allocation2 + $0x38] sm:$0xff]  ;;  %s1252_s19 = sshll.u32 %s1763_s28, 5 }
  0x30   : > { %v357_v5 = vmax.f32 %v355_v2, 0.0  ;;  %v356_v10 = vmax.f32 %v354_v7, 0.0  ;;  %v480_v27 = vld [vmem:[#allocation2 + $0x20] sm:$0xff]  ;;  %v1258_v28 = vpack.c.bf16 %v483_v26, %v481_v25  ;;  %v482_v29 = vld [vmem:[#allocation2 + $0x30] sm:$0xff]  ;;  %v613_v30 = vld [vmem:[#allocation2 + $0x448] sm:$0xff]  ;;  %1387 = vmatprep.subr.bf16.mxu1 %v1386_v23  ;;  %s348_s22 = scalar_lea.vmem %s1753_s7, %s1252_s19  ;;  %s353_s13 = scalar_lea.vmem %s1754_s8, %s1252_s19 }
  0x31   : > { %v615_v31 = vld [vmem:[#allocation2 + $0x458] sm:$0xff]  ;;  %v1260_v32 = vpack.c.bf16 %v482_v29, %v480_v27  ;;  %v612_v34 = vld [vmem:[#allocation2 + $0x440] sm:$0xff]  ;;  %v614_v35 = vld [vmem:[#allocation2 + $0x450] sm:$0xff] }
  0x32   : > { %379 = vmatprep.subr.mxu0 %v357_v5  ;;  %v1390_v33 = vpack.c.bf16 %v615_v31, %v613_v30  ;;  %v485_v36 = vld [vmem:[#allocation2 + $0x48] sm:$0xff]  ;;  %1389 = vmatpush1.bf16.msra.mxu1 %v1388_v24  ;;  %v1392_v37 = vpack.c.bf16 %v614_v35, %v612_v34  ;;  %v487_v38 = vld [vmem:[#allocation2 + $0x58] sm:$0xff]  ;;  %v484_v39 = vld [vmem:[#allocation2 + $0x40] sm:$0xff] }
  0x33   : > { %380 = vmatpush1.msra.mxu0 %v356_v10  ;;  %v486_v40 = vld [vmem:[#allocation2 + $0x50] sm:$0xff]  ;;  %v1262_v41 = vpack.c.bf16 %v487_v38, %v485_v36  ;;  %v617_v42 = vld [vmem:[#allocation2 + $0x468] sm:$0xff]  ;;  %v619_v43 = vld [vmem:[#allocation2 + $0x478] sm:$0xff] }
  0x34   : > { %1244 = vmatmul.mubr.msk.f32.vlgmr.msra.gmra.mrb[0].mxu0 %vm372_vm0, %v358_v12  ;;  %1255 = vmatprep.subr.bf16.mxu0 %v1254_v15  ;;  %v616_v44 = vld [vmem:[#allocation2 + $0x460] sm:$0xff]  ;;  %v1264_v45 = vpack.c.bf16 %v486_v40, %v484_v39  ;;  %v1394_v46 = vpack.c.bf16 %v619_v43, %v617_v42  ;;  %v618_v47 = vld [vmem:[#allocation2 + $0x470] sm:$0xff]  ;;  %v489_v48 = vld [vmem:[#allocation2 + $0x68] sm:$0xff] }
  0x35   : > { %1257 = vmatpush1.bf16.msra.mxu0 %v1256_v19  ;;  %449 = vmatprep.mubr.f32.mxu0 %v1586_v0  ;;  %v491_v49 = vld [vmem:[#allocation2 + $0x78] sm:$0xff]  ;;  %v488_v51 = vld [vmem:[#allocation2 + $0x60] sm:$0xff]  ;;  %v490_v52 = vld [vmem:[#allocation2 + $0x70] sm:$0xff]  ;;  %v1396_v54 = vpack.c.bf16 %v618_v47, %v616_v44 }
  0x36   : > { %1259 = vmatprep.subr.bf16.mxu0 %v1258_v28  ;;  %1391 = vmatprep.subr.bf16.mxu1 %v1390_v33  ;;  %v1266_v50 = vpack.c.bf16 %v491_v49, %v489_v48  ;;  %v621_v53 = vld [vmem:[#allocation2 + $0x488] sm:$0xff]  ;;  %v623_v55 = vld [vmem:[#allocation2 + $0x498] sm:$0xff]  ;;  %v620_v56 = vld [vmem:[#allocation2 + $0x480] sm:$0xff]  ;;  %v1268_v61 = vpack.c.bf16 %v490_v52, %v488_v51 }
  0x37   : > { %1393 = vmatpush1.bf16.msra.mxu1 %v1392_v37  ;;  %v1398_v57 = vpack.c.bf16 %v623_v55, %v621_v53  ;;  %v622_v58 = vld [vmem:[#allocation2 + $0x490] sm:$0xff]  ;;  %v493_v59 = vld [vmem:[#allocation2 + $0x88] sm:$0xff]  ;;  %v495_v60 = vld [vmem:[#allocation2 + $0x98] sm:$0xff] }
  0x38   : > { %1395 = vmatprep.subr.bf16.mxu1 %v1394_v46  ;;  %v625_v62 = vld [vmem:[#allocation2 + $0x4a8] sm:$0xff]  ;;  %v627_v63 = vld [vmem:[#allocation2 + $0x4b8] sm:$0xff]  ;;  %v1270_v1 = vpack.c.bf16 %v495_v60, %v493_v59  ;;  %v492_v2 = vld [vmem:[#allocation2 + $0x80] sm:$0xff]  ;;  %v1400_v4 = vpack.c.bf16 %v622_v58, %v620_v56 }
  0x39   : > { %1261 = vmatpush1.bf16.msra.mxu0 %v1260_v32  ;;  %v494_v3 = vld [vmem:[#allocation2 + $0x90] sm:$0xff]  ;;  %v497_v5 = vld [vmem:[#allocation2 + $0xa8] sm:$0xff]  ;;  %v499_v6 = vld [vmem:[#allocation2 + $0xb8] sm:$0xff]  ;;  %v1402_v7 = vpack.c.bf16 %v627_v63, %v625_v62 }
  0x3a   : > { %1263 = vmatprep.subr.bf16.mxu0 %v1262_v41  ;;  %v624_v8 = vld [vmem:[#allocation2 + $0x4a0] sm:$0xff]  ;;  %v626_v9 = vld [vmem:[#allocation2 + $0x4b0] sm:$0xff]  ;;  %v1272_v10 = vpack.c.bf16 %v494_v3, %v492_v2  ;;  %v629_v11 = vld [vmem:[#allocation2 + $0x4c8] sm:$0xff]  ;;  %v1274_v13 = vpack.c.bf16 %v499_v6, %v497_v5 }
  0x3b   : > { %1397 = vmatpush1.bf16.msra.mxu1 %v1396_v54  ;;  %v631_v12 = vld [vmem:[#allocation2 + $0x4d8] sm:$0xff]  ;;  %v496_v14 = vld [vmem:[#allocation2 + $0xa0] sm:$0xff]  ;;  %v498_v15 = vld [vmem:[#allocation2 + $0xb0] sm:$0xff]  ;;  %v1404_v16 = vpack.c.bf16 %v626_v9, %v624_v8 }
  0x3c   : > { %1399 = vmatprep.subr.bf16.mxu1 %v1398_v57  ;;  %v501_v17 = vld [vmem:[#allocation2 + $0xc8] sm:$0xff]  ;;  %v503_v18 = vld [vmem:[#allocation2 + $0xd8] sm:$0xff]  ;;  %v1406_v19 = vpack.c.bf16 %v631_v12, %v629_v11  ;;  %v628_v20 = vld [vmem:[#allocation2 + $0x4c0] sm:$0xff]  ;;  %v1276_v22 = vpack.c.bf16 %v498_v15, %v496_v14 }
  0x3d   : > { %1265 = vmatpush1.bf16.msra.mxu0 %v1264_v45  ;;  %v630_v21 = vld [vmem:[#allocation2 + $0x4d0] sm:$0xff]  ;;  %v633_v23 = vld [vmem:[#allocation2 + $0x4e8] sm:$0xff]  ;;  %v635_v24 = vld [vmem:[#allocation2 + $0x4f8] sm:$0xff]  ;;  %v1278_v25 = vpack.c.bf16 %v503_v18, %v501_v17 }
  0x3e   : > { %1267 = vmatprep.subr.bf16.mxu0 %v1266_v50  ;;  %v500_v26 = vld [vmem:[#allocation2 + $0xc0] sm:$0xff]  ;;  %v502_v27 = vld [vmem:[#allocation2 + $0xd0] sm:$0xff]  ;;  %v1408_v28 = vpack.c.bf16 %v630_v21, %v628_v20  ;;  %v505_v29 = vld [vmem:[#allocation2 + $0xe8] sm:$0xff]  ;;  %v1410_v31 = vpack.c.bf16 %v635_v24, %v633_v23 }
  0x3f   : > { %1401 = vmatpush1.bf16.msra.mxu1 %v1400_v4  ;;  %v507_v30 = vld [vmem:[#allocation2 + $0xf8] sm:$0xff]  ;;  %v632_v32 = vld [vmem:[#allocation2 + $0x4e0] sm:$0xff]  ;;  %v634_v33 = vld [vmem:[#allocation2 + $0x4f0] sm:$0xff]  ;;  %v1280_v34 = vpack.c.bf16 %v502_v27, %v500_v26 }
  0x40   : > { %1403 = vmatprep.subr.bf16.mxu1 %v1402_v7  ;;  %v637_v35 = vld [vmem:[#allocation2 + $0x508] sm:$0xff]  ;;  %v639_v36 = vld [vmem:[#allocation2 + $0x518] sm:$0xff]  ;;  %v1282_v37 = vpack.c.bf16 %v507_v30, %v505_v29  ;;  %v504_v38 = vld [vmem:[#allocation2 + $0xe0] sm:$0xff]  ;;  %v1412_v40 = vpack.c.bf16 %v634_v33, %v632_v32 }
  0x41   : > { %1269 = vmatpush1.bf16.msra.mxu0 %v1268_v61  ;;  %v506_v39 = vld [vmem:[#allocation2 + $0xf0] sm:$0xff]  ;;  %v509_v41 = vld [vmem:[#allocation2 + $0x108] sm:$0xff]  ;;  %v511_v42 = vld [vmem:[#allocation2 + $0x118] sm:$0xff]  ;;  %v1414_v43 = vpack.c.bf16 %v639_v36, %v637_v35 }
  0x42   : > { %1271 = vmatprep.subr.bf16.mxu0 %v1270_v1  ;;  %v636_v44 = vld [vmem:[#allocation2 + $0x500] sm:$0xff]  ;;  %v638_v45 = vld [vmem:[#allocation2 + $0x510] sm:$0xff]  ;;  %v1284_v46 = vpack.c.bf16 %v506_v39, %v504_v38  ;;  %v641_v47 = vld [vmem:[#allocation2 + $0x528] sm:$0xff]  ;;  %v1286_v49 = vpack.c.bf16 %v511_v42, %v509_v41 }
  0x43   : > { %1405 = vmatpush1.bf16.msra.mxu1 %v1404_v16  ;;  %v643_v48 = vld [vmem:[#allocation2 + $0x538] sm:$0xff]  ;;  %v508_v50 = vld [vmem:[#allocation2 + $0x100] sm:$0xff]  ;;  %v510_v51 = vld [vmem:[#allocation2 + $0x110] sm:$0xff]  ;;  %v1416_v52 = vpack.c.bf16 %v638_v45, %v636_v44 }
  0x44   : > { %1407 = vmatprep.subr.bf16.mxu1 %v1406_v19  ;;  %v513_v53 = vld [vmem:[#allocation2 + $0x128] sm:$0xff]  ;;  %v515_v54 = vld [vmem:[#allocation2 + $0x138] sm:$0xff]  ;;  %v1418_v55 = vpack.c.bf16 %v643_v48, %v641_v47  ;;  %v640_v56 = vld [vmem:[#allocation2 + $0x520] sm:$0xff]  ;;  %v1288_v58 = vpack.c.bf16 %v510_v51, %v508_v50 }
  0x45   : > { %1273 = vmatpush1.bf16.msra.mxu0 %v1272_v10  ;;  %v642_v57 = vld [vmem:[#allocation2 + $0x530] sm:$0xff]  ;;  %v645_v59 = vld [vmem:[#allocation2 + $0x548] sm:$0xff]  ;;  %v647_v60 = vld [vmem:[#allocation2 + $0x558] sm:$0xff]  ;;  %v1290_v61 = vpack.c.bf16 %v515_v54, %v513_v53 }
  0x46   : > { %1275 = vmatprep.subr.bf16.mxu0 %v1274_v13  ;;  %v512_v62 = vld [vmem:[#allocation2 + $0x120] sm:$0xff]  ;;  %v514_v63 = vld [vmem:[#allocation2 + $0x130] sm:$0xff]  ;;  %v1420_v1 = vpack.c.bf16 %v642_v57, %v640_v56  ;;  %v517_v2 = vld [vmem:[#allocation2 + $0x148] sm:$0xff]  ;;  %v1422_v4 = vpack.c.bf16 %v647_v60, %v645_v59 }
  0x47   : > { %1409 = vmatpush1.bf16.msra.mxu1 %v1408_v28  ;;  %v519_v3 = vld [vmem:[#allocation2 + $0x158] sm:$0xff]  ;;  %v644_v5 = vld [vmem:[#allocation2 + $0x540] sm:$0xff]  ;;  %v646_v6 = vld [vmem:[#allocation2 + $0x550] sm:$0xff]  ;;  %v1292_v7 = vpack.c.bf16 %v514_v63, %v512_v62 }
  0x48   : > { %1411 = vmatprep.subr.bf16.mxu1 %v1410_v31  ;;  %v649_v8 = vld [vmem:[#allocation2 + $0x568] sm:$0xff]  ;;  %v651_v9 = vld [vmem:[#allocation2 + $0x578] sm:$0xff]  ;;  %v1294_v10 = vpack.c.bf16 %v519_v3, %v517_v2  ;;  %v516_v11 = vld [vmem:[#allocation2 + $0x140] sm:$0xff]  ;;  %v1424_v13 = vpack.c.bf16 %v646_v6, %v644_v5 }
  0x49   : > { %1277 = vmatpush1.bf16.msra.mxu0 %v1276_v22  ;;  %v518_v12 = vld [vmem:[#allocation2 + $0x150] sm:$0xff]  ;;  %v521_v14 = vld [vmem:[#allocation2 + $0x168] sm:$0xff]  ;;  %v523_v15 = vld [vmem:[#allocation2 + $0x178] sm:$0xff]  ;;  %v1426_v16 = vpack.c.bf16 %v651_v9, %v649_v8 }
  0x4a   : > { %1279 = vmatprep.subr.bf16.mxu0 %v1278_v25  ;;  %v648_v17 = vld [vmem:[#allocation2 + $0x560] sm:$0xff]  ;;  %v650_v18 = vld [vmem:[#allocation2 + $0x570] sm:$0xff]  ;;  %v1296_v19 = vpack.c.bf16 %v518_v12, %v516_v11  ;;  %v653_v20 = vld [vmem:[#allocation2 + $0x588] sm:$0xff]  ;;  %v1298_v23 = vpack.c.bf16 %v523_v15, %v521_v14 }
  0x4b   : > { %1413 = vmatpush1.bf16.msra.mxu1 %v1412_v40  ;;  %v655_v21 = vld [vmem:[#allocation2 + $0x598] sm:$0xff]  ;;  %v359_v22 = vld [vmem:[%s1748_s2 + $0x8] sm:$0xff]  ;;  %v520_v24 = vld [vmem:[#allocation2 + $0x160] sm:$0xff]  ;;  %v1428_v26 = vpack.c.bf16 %v650_v18, %v648_v17 }
  0x4c   : > { %1415 = vmatprep.subr.bf16.mxu1 %v1414_v43  ;;  %v522_v25 = vld [vmem:[#allocation2 + $0x170] sm:$0xff]  ;;  %1245 = vmatmul.mubr.msk.f32.gmra.mrb[2].mxu0 %vm372_vm0, %v359_v22  ;;  %v525_v27 = vld [vmem:[#allocation2 + $0x188] sm:$0xff]  ;;  %v527_v28 = vld [vmem:[#allocation2 + $0x198] sm:$0xff]  ;;  %v1430_v30 = vpack.c.bf16 %v655_v21, %v653_v20 }
  0x4d   : > { %1281 = vmatpush1.bf16.msra.mxu0 %v1280_v34  ;;  %v465_v29 = vld [vmem:[%s1696_s12 + $0x28] sm:$0xff]  ;;  %v652_v31 = vld [vmem:[#allocation2 + $0x580] sm:$0xff]  ;;  %v654_v32 = vld [vmem:[#allocation2 + $0x590] sm:$0xff]  ;;  %v1300_v34 = vpack.c.bf16 %v522_v25, %v520_v24  ;;  %v1302_v38 = vpack.c.bf16 %v527_v28, %v525_v27 }
  0x4e   : > { %1283 = vmatprep.subr.bf16.mxu0 %v1282_v37  ;;  %v473_v33 = vmax.f32 %v465_v29, 0.0  ;;  %v657_v35 = vld [vmem:[#allocation2 + $0x5a8] sm:$0xff]  ;;  %v659_v36 = vld [vmem:[#allocation2 + $0x5b8] sm:$0xff]  ;;  %v524_v39 = vld [vmem:[#allocation2 + $0x180] sm:$0xff]  ;;  %v1432_v42 = vpack.c.bf16 %v654_v32, %v652_v31 }
  0x4f   : > { %1417 = vmatpush1.bf16.msra.mxu1 %v1416_v52  ;;  %v461_v37 = vld [vmem:[%s1696_s12 + $0x8] sm:$0xff]  ;;  %v526_v40 = vld [vmem:[#allocation2 + $0x190] sm:$0xff]  ;;  %v531_v44 = vld [vmem:[#allocation2 + $0x1b8] sm:$0xff]  ;;  %v1434_v45 = vpack.c.bf16 %v659_v36, %v657_v35 }
  0x50   : > { %1419 = vmatprep.subr.bf16.mxu1 %v1418_v55  ;;  %938 = vmatprep.mubr.f32.mxu1 %v473_v33  ;;  %v469_v41 = vmax.f32 %v461_v37, 0.0  ;;  %v529_v43 = vld [vmem:[#allocation2 + $0x1a8] sm:$0xff]  ;;  %v658_v47 = vld [vmem:[#allocation2 + $0x5b0] sm:$0xff]  ;;  %v1304_v48 = vpack.c.bf16 %v526_v40, %v524_v39  ;;  %v663_v50 = vld [vmem:[#allocation2 + $0x5d8] sm:$0xff] }
  0x51   : > { %1285 = vmatpush1.bf16.msra.mxu0 %v1284_v46  ;;  %v656_v46 = vld [vmem:[#allocation2 + $0x5a0] sm:$0xff]  ;;  %v1306_v51 = vpack.c.bf16 %v531_v44, %v529_v43  ;;  %v530_v53 = vld [vmem:[#allocation2 + $0x1b0] sm:$0xff]  ;;  %v533_v55 = vld [vmem:[#allocation2 + $0x1c8] sm:$0xff] }
  0x52   : > { %1287 = vmatprep.subr.bf16.mxu0 %v1286_v49  ;;  %796 = vmatprep.mubr.f32.mxu0 %v469_v41  ;;  %v661_v49 = vld [vmem:[#allocation2 + $0x5c8] sm:$0xff]  ;;  %v528_v52 = vld [vmem:[#allocation2 + $0x1a0] sm:$0xff]  ;;  %v1436_v54 = vpack.c.bf16 %v658_v47, %v656_v46  ;;  %v535_v56 = vld [vmem:[#allocation2 + $0x1d8] sm:$0xff] }
  0x53   : > { %1421 = vmatpush1.bf16.msra.mxu1 %v1420_v1  ;;  %v1438_v57 = vpack.c.bf16 %v663_v50, %v661_v49  ;;  %v662_v59 = vld [vmem:[#allocation2 + $0x5d0] sm:$0xff]  ;;  %v1308_v60 = vpack.c.bf16 %v530_v53, %v528_v52  ;;  %v667_v62 = vld [vmem:[#allocation2 + $0x5f8] sm:$0xff]  ;;  %v1310_v63 = vpack.c.bf16 %v535_v56, %v533_v55  ;;  %v532_v1 = vld [vmem:[#allocation2 + $0x1c0] sm:$0xff] }
  0x54   : > { %1423 = vmatprep.subr.bf16.mxu1 %v1422_v4  ;;  %v534_v2 = vld [vmem:[#allocation2 + $0x1d0] sm:$0xff]  ;;  %v537_v4 = vld [vmem:[#allocation2 + $0x1e8] sm:$0xff]  ;;  %v539_v5 = vld [vmem:[#allocation2 + $0x1f8] sm:$0xff] }
  0x55   : > { %1289 = vmatpush1.bf16.msra.mxu0 %v1288_v58  ;;  %v660_v58 = vld [vmem:[#allocation2 + $0x5c0] sm:$0xff]  ;;  %v666_v8 = vld [vmem:[#allocation2 + $0x5f0] sm:$0xff]  ;;  %v1312_v9 = vpack.c.bf16 %v534_v2, %v532_v1  ;;  %v671_v11 = vld [vmem:[#allocation2 + $0x618] sm:$0xff]  ;;  %v1314_v12 = vpack.c.bf16 %v539_v5, %v537_v4 }
  0x56   : > { %1291 = vmatprep.subr.bf16.mxu0 %v1290_v61  ;;  %v665_v61 = vld [vmem:[#allocation2 + $0x5e8] sm:$0xff]  ;;  %v1440_v3 = vpack.c.bf16 %v662_v59, %v660_v58  ;;  %v538_v14 = vld [vmem:[#allocation2 + $0x1f0] sm:$0xff]  ;;  %v464_v15 = vld [vmem:[%s1696_s12 + $0x20] sm:$0xff] }
  0x57   : > { %1425 = vmatpush1.bf16.msra.mxu1 %v1424_v13  ;;  %v1442_v6 = vpack.c.bf16 %v667_v62, %v665_v61  ;;  %v536_v13 = vld [vmem:[#allocation2 + $0x1e0] sm:$0xff]  ;;  %v541_v17 = vld [vmem:[#allocation2 + $0x208] sm:$0xff]  ;;  %v543_v18 = vld [vmem:[#allocation2 + $0x218] sm:$0xff]  ;;  %v472_v27 = vmax.f32 %v464_v15, 0.0 }
  0x58   : > { %1427 = vmatprep.subr.bf16.mxu1 %v1426_v16  ;;  %v668_v21 = vld [vmem:[#allocation2 + $0x600] sm:$0xff]  ;;  %v670_v22 = vld [vmem:[#allocation2 + $0x610] sm:$0xff]  ;;  %v673_v25 = vld [vmem:[#allocation2 + $0x628] sm:$0xff]  ;;  %v1318_v28 = vpack.c.bf16 %v543_v18, %v541_v17 }
  0x59   : > { %1293 = vmatpush1.bf16.msra.mxu0 %v1292_v7  ;;  %v664_v7 = vld [vmem:[#allocation2 + $0x5e0] sm:$0xff]  ;;  %v1448_v31 = vpack.c.bf16 %v670_v22, %v668_v21  ;;  %v545_v32 = vld [vmem:[#allocation2 + $0x228] sm:$0xff]  ;;  %v547_v33 = vld [vmem:[#allocation2 + $0x238] sm:$0xff] }
  0x5a   : > { %1295 = vmatprep.subr.bf16.mxu0 %v1294_v10  ;;  %v669_v10 = vld [vmem:[#allocation2 + $0x608] sm:$0xff]  ;;  %v1444_v16 = vpack.c.bf16 %v666_v8, %v664_v7  ;;  %v460_v24 = vld [vmem:[%s1696_s12] sm:$0xff]  ;;  %v674_v37 = vld [vmem:[#allocation2 + $0x630] sm:$0xff]  ;;  %v1322_v41 = vpack.c.bf16 %v547_v33, %v545_v32 }
  0x5b   : > { %1429 = vmatpush1.bf16.msra.mxu1 %v1428_v26  ;;  %v1446_v20 = vpack.c.bf16 %v671_v11, %v669_v10  ;;  %v675_v26 = vld [vmem:[#allocation2 + $0x638] sm:$0xff]  ;;  %v540_v29 = vld [vmem:[#allocation2 + $0x200] sm:$0xff]  ;;  %v677_v39 = vld [vmem:[#allocation2 + $0x648] sm:$0xff] }
  0x5c   : > { %1431 = vmatprep.subr.bf16.mxu1 %v1430_v30  ;;  %v542_v30 = vld [vmem:[#allocation2 + $0x210] sm:$0xff]  ;;  %v1450_v35 = vpack.c.bf16 %v675_v26, %v673_v25  ;;  %v672_v36 = vld [vmem:[#allocation2 + $0x620] sm:$0xff]  ;;  %v679_v40 = vld [vmem:[#allocation2 + $0x658] sm:$0xff] }
  0x5d   : > { %1297 = vmatpush1.bf16.msra.mxu0 %v1296_v19  ;;  %v360_v19 = vld [vmem:[%s1749_s3] sm:$0xff]  ;;  %v546_v43 = vld [vmem:[#allocation2 + $0x230] sm:$0xff]  ;;  %v1452_v44 = vpack.c.bf16 %v674_v37, %v672_v36  ;;  %v551_v46 = vld [vmem:[#allocation2 + $0x258] sm:$0xff]  ;;  %v1454_v47 = vpack.c.bf16 %v679_v40, %v677_v39 }
  0x5e   : > { %1299 = vmatprep.subr.bf16.mxu0 %v1298_v23  ;;  %364 = vperm.xlu0 %1541, %v360_v19   ;;  %v1316_v23 = vpack.c.bf16 %v538_v14, %v536_v13  ;;  %v678_v49 = vld [vmem:[#allocation2 + $0x650] sm:$0xff]  ;;  %v683_v52 = vld [vmem:[#allocation2 + $0x678] sm:$0xff]  ;;  %v556_v15 = vld [vmem:[#allocation2 + $0x280] sm:$0xff] }
  0x5f   : > { %1433 = vmatpush1.bf16.msra.mxu1 %v1432_v42  ;;  %v544_v42 = vld [vmem:[#allocation2 + $0x220] sm:$0xff]  ;;  %v550_v55 = vld [vmem:[#allocation2 + $0x250] sm:$0xff]  ;;  %v555_v58 = vld [vmem:[#allocation2 + $0x278] sm:$0xff] }
  0x60   : > { %1435 = vmatprep.subr.bf16.mxu1 %v1434_v45  ;;  %v549_v45 = vld [vmem:[#allocation2 + $0x248] sm:$0xff]  ;;  %v1324_v50 = vpack.c.bf16 %v546_v43, %v544_v42  ;;  %v682_v61 = vld [vmem:[#allocation2 + $0x670] sm:$0xff]  ;;  %v687_v1 = vld [vmem:[#allocation2 + $0x698] sm:$0xff] }
  0x61   : > { %1301 = vmatpush1.bf16.msra.mxu0 %v1300_v34  ;;  %v468_v34 = vmax.f32 %v460_v24, 0.0  ;;  %v1326_v53 = vpack.c.bf16 %v551_v46, %v549_v45  ;;  %v554_v4 = vld [vmem:[#allocation2 + $0x270] sm:$0xff]  ;;  %v559_v7 = vld [vmem:[#allocation2 + $0x298] sm:$0xff]  ;;  %v561_v18 = vld [vmem:[#allocation2 + $0x2a8] sm:$0xff] }
  0x62   : > { %1303 = vmatprep.subr.bf16.mxu0 %v1302_v38  ;;  %v1320_v38 = vpack.c.bf16 %v542_v30, %v540_v29  ;;  %v686_v10 = vld [vmem:[#allocation2 + $0x690] sm:$0xff]  ;;  %v691_v13 = vld [vmem:[#allocation2 + $0x6b8] sm:$0xff]  ;;  %v688_v21 = vld [vmem:[#allocation2 + $0x6a0] sm:$0xff] }
  0x63   : > { %1437 = vmatpush1.bf16.msra.mxu1 %v1436_v54  ;;  %v548_v54 = vld [vmem:[#allocation2 + $0x240] sm:$0xff]  ;;  %v563_v19 = vld [vmem:[#allocation2 + $0x2b8] sm:$0xff]  ;;  %v690_v22 = vld [vmem:[#allocation2 + $0x6b0] sm:$0xff] }
  0x64   : > { %1439 = vmatprep.subr.bf16.mxu1 %v1438_v57  ;;  %v553_v57 = vld [vmem:[#allocation2 + $0x268] sm:$0xff]  ;;  %v1328_v62 = vpack.c.bf16 %v550_v55, %v548_v54  ;;  %v695_v25 = vld [vmem:[#allocation2 + $0x6d8] sm:$0xff]  ;;  %v1338_v26 = vpack.c.bf16 %v563_v19, %v561_v18  ;;  %v1468_v29 = vpack.c.bf16 %v690_v22, %v688_v21  ;;  %v692_v33 = vld [vmem:[#allocation2 + $0x6c0] sm:$0xff] }
  0x65   : > { %1305 = vmatpush1.bf16.msra.mxu0 %v1304_v48  ;;  %v676_v48 = vld [vmem:[#allocation2 + $0x640] sm:$0xff]  ;;  %v1330_v2 = vpack.c.bf16 %v555_v58, %v553_v57  ;;  %v693_v24 = vld [vmem:[#allocation2 + $0x6c8] sm:$0xff]  ;;  %v699_v37 = vld [vmem:[#allocation2 + $0x6f8] sm:$0xff] }
  0x66   : > { %1307 = vmatprep.subr.bf16.mxu0 %v1306_v51  ;;  %v681_v51 = vld [vmem:[#allocation2 + $0x668] sm:$0xff]  ;;  %v1456_v56 = vpack.c.bf16 %v678_v49, %v676_v48  ;;  %v1470_v32 = vpack.c.bf16 %v695_v25, %v693_v24  ;;  %v564_v39 = vld [vmem:[#allocation2 + $0x2c0] sm:$0xff]  ;;  %v566_v40 = vld [vmem:[#allocation2 + $0x2d0] sm:$0xff] }
  0x67   : > { %1441 = vmatpush1.bf16.msra.mxu1 %v1440_v3  ;;  %v1458_v59 = vpack.c.bf16 %v683_v52, %v681_v51  ;;  %v552_v3 = vld [vmem:[#allocation2 + $0x260] sm:$0xff]  ;;  %v565_v30 = vld [vmem:[#allocation2 + $0x2c8] sm:$0xff]  ;;  %v467_v45 = vld [vmem:[%s1696_s12 + $0x38] sm:$0xff]  ;;  %v1344_v51 = vpack.c.bf16 %v566_v40, %v564_v39 }
  0x68   : > { %1443 = vmatprep.subr.bf16.mxu1 %v1442_v6  ;;  %v557_v6 = vld [vmem:[#allocation2 + $0x288] sm:$0xff]  ;;  %v1332_v11 = vpack.c.bf16 %v554_v4, %v552_v3  ;;  %v475_v48 = vmax.f32 %v467_v45, 0.0  ;;  %v463_v49 = vld [vmem:[%s1696_s12 + $0x18] sm:$0xff]  ;;  %v570_v57 = vld [vmem:[#allocation2 + $0x2f0] sm:$0xff] }
  0x69   : > { %1309 = vmatpush1.bf16.msra.mxu0 %v1308_v60  ;;  %v680_v60 = vld [vmem:[#allocation2 + $0x660] sm:$0xff]  ;;  %v1334_v14 = vpack.c.bf16 %v559_v7, %v557_v6  ;;  %v697_v36 = vld [vmem:[#allocation2 + $0x6e8] sm:$0xff]  ;;  %v471_v54 = vmax.f32 %v463_v49, 0.0  ;;  %v707_v3 = vld [vmem:[#allocation2 + $0x738] sm:$0xff] }
  0x6a   : > { %1311 = vmatprep.subr.bf16.mxu0 %v1310_v63  ;;  %v685_v63 = vld [vmem:[#allocation2 + $0x688] sm:$0xff]  ;;  %v1460_v5 = vpack.c.bf16 %v682_v61, %v680_v60  ;;  %v1474_v46 = vpack.c.bf16 %v699_v37, %v697_v36  ;;  %v575_v60 = vld [vmem:[#allocation2 + $0x318] sm:$0xff]  ;;  %v574_v6 = vld [vmem:[#allocation2 + $0x310] sm:$0xff] }
  0x6b   : > { %1445 = vmatpush1.bf16.msra.mxu1 %v1444_v16  ;;  %v1462_v8 = vpack.c.bf16 %v687_v1, %v685_v63  ;;  %v558_v16 = vld [vmem:[#allocation2 + $0x290] sm:$0xff]  ;;  %v569_v43 = vld [vmem:[#allocation2 + $0x2e8] sm:$0xff]  ;;  %v583_v21 = vld [vmem:[#allocation2 + $0x358] sm:$0xff] }
  0x6c   : > { %1447 = vmatprep.subr.bf16.mxu1 %v1446_v20  ;;  %v701_v52 = vld [vmem:[#allocation2 + $0x708] sm:$0xff]  ;;  %v702_v63 = vld [vmem:[#allocation2 + $0x710] sm:$0xff]  ;;  %v719_v39 = vld [vmem:[#allocation2 + $0x798] sm:$0xff] }
  0x6d   : > { %1313 = vmatpush1.bf16.msra.mxu0 %v1312_v9  ;;  %v684_v9 = vld [vmem:[#allocation2 + $0x680] sm:$0xff]  ;;  %v578_v18 = vld [vmem:[#allocation2 + $0x330] sm:$0xff]  ;;  %v591_v45 = vld [vmem:[#allocation2 + $0x398] sm:$0xff] }
  0x6e   : > { %1315 = vmatprep.subr.bf16.mxu0 %v1314_v12  ;;  %939 = vmatmul.mubr.f32.vlgmr.msra.gmra.mrb[0].mxu1 %v472_v27  ;;  %v689_v12 = vld [vmem:[#allocation2 + $0x6a8] sm:$0xff]  ;;  %v1464_v17 = vpack.c.bf16 %v686_v10, %v684_v9  ;;  %v560_v27 = vld [vmem:[#allocation2 + $0x2a0] sm:$0xff]  ;;  %v579_v9 = vld [vmem:[#allocation2 + $0x338] sm:$0xff] }
  0x6f   : > { %1449 = vmatpush1.bf16.msra.mxu1 %v1448_v31  ;;  %v1466_v20 = vpack.c.bf16 %v691_v13, %v689_v12  ;;  %v567_v31 = vld [vmem:[#allocation2 + $0x2d8] sm:$0xff]  ;;  %1009 = vmatprep.mubr.f32.mxu1 %v475_v48  ;;  %v706_v12 = vld [vmem:[#allocation2 + $0x730] sm:$0xff] }
  0x70   : > { %1451 = vmatprep.subr.bf16.mxu1 %v1450_v35  ;;  %v710_v24 = vld [vmem:[#allocation2 + $0x750] sm:$0xff] }
  0x71   : > { %1317 = vmatpush1.bf16.msra.mxu0 %v1316_v23  ;;  %v1336_v23 = vpack.c.bf16 %v558_v16, %v556_v15  ;;  %v711_v15 = vld [vmem:[#allocation2 + $0x758] sm:$0xff]  ;;  %v714_v36 = vld [vmem:[#allocation2 + $0x770] sm:$0xff] }
  0x72   : > { %1319 = vmatprep.subr.bf16.mxu0 %v1318_v28  ;;  %v562_v28 = vld [vmem:[#allocation2 + $0x2b0] sm:$0xff] }
  0x73   : > { %1453 = vmatpush1.bf16.msra.mxu1 %v1452_v44  ;;  %v1340_v35 = vpack.c.bf16 %v562_v28, %v560_v27  ;;  %v571_v44 = vld [vmem:[#allocation2 + $0x2f8] sm:$0xff]  ;;  %v718_v48 = vld [vmem:[#allocation2 + $0x790] sm:$0xff] }
  0x74   : > { %797 = vmatmul.mubr.f32.vlgmr.msra.gmra.mrb[4].mxu0 %v468_v34  ;;  %1455 = vmatprep.subr.bf16.mxu1 %v1454_v47  ;;  %v694_v34 = vld [vmem:[#allocation2 + $0x6d0] sm:$0xff]  ;;  %v1346_v55 = vpack.c.bf16 %v571_v44, %v569_v43  ;;  %v715_v27 = vld [vmem:[#allocation2 + $0x778] sm:$0xff]  ;;  %v589_v44 = vld [vmem:[#allocation2 + $0x388] sm:$0xff] }
  0x75   : > { %1321 = vmatpush1.bf16.msra.mxu0 %v1320_v38  ;;  %v1342_v38 = vpack.c.bf16 %v567_v31, %v565_v30  ;;  %v1472_v42 = vpack.c.bf16 %v694_v34, %v692_v33  ;;  %v698_v47 = vld [vmem:[#allocation2 + $0x6f0] sm:$0xff]  ;;  %867 = vmatprep.mubr.f32.mxu0 %v471_v54  ;;  %v587_v33 = vld [vmem:[#allocation2 + $0x378] sm:$0xff] }
  0x76   : > { %1323 = vmatprep.subr.bf16.mxu0 %v1322_v41  ;;  %v696_v41 = vld [vmem:[#allocation2 + $0x6e0] sm:$0xff]  ;;  %v582_v30 = vld [vmem:[#allocation2 + $0x350] sm:$0xff] }
  0x77   : > { %1457 = vmatpush1.bf16.msra.mxu1 %v1456_v56  ;;  %v568_v56 = vld [vmem:[#allocation2 + $0x2e0] sm:$0xff]  ;;  %v1476_v58 = vpack.c.bf16 %v698_v47, %v696_v41  ;;  %v590_v54 = vld [vmem:[#allocation2 + $0x390] sm:$0xff] }
  0x78   : > { %1459 = vmatprep.subr.bf16.mxu1 %v1458_v59  ;;  %v573_v59 = vld [vmem:[#allocation2 + $0x308] sm:$0xff]  ;;  %v1348_v1 = vpack.c.bf16 %v570_v57, %v568_v56  ;;  %v584_v41 = vld [vmem:[#allocation2 + $0x360] sm:$0xff]  ;;  %v595_v57 = vld [vmem:[#allocation2 + $0x3b8] sm:$0xff] }
  0x79   : > { %1325 = vmatpush1.bf16.msra.mxu0 %v1324_v50  ;;  %v361_v50 = vld [vmem:[%s1749_s3 + $0x8] sm:$0xff]  ;;  %v1350_v4 = vpack.c.bf16 %v575_v60, %v573_v59  ;;  %v716_v47 = vld [vmem:[#allocation2 + $0x780] sm:$0xff]  ;;  %v722_v60 = vld [vmem:[#allocation2 + $0x7b0] sm:$0xff] }
  0x7a   : > { %1327 = vmatprep.subr.bf16.mxu0 %v1326_v53  ;;  %v703_v53 = vld [vmem:[#allocation2 + $0x718] sm:$0xff]  ;;  %369 = vperm.xlu0 %1541, %v361_v50   ;;  %v721_v50 = vld [vmem:[#allocation2 + $0x7a8] sm:$0xff]  ;;  %v720_v59 = vld [vmem:[#allocation2 + $0x7a0] sm:$0xff] }
  0x7b   : > { %1461 = vmatpush1.bf16.msra.mxu1 %v1460_v5  ;;  %v1478_v61 = vpack.c.bf16 %v703_v53, %v701_v52  ;;  %v572_v5 = vld [vmem:[#allocation2 + $0x300] sm:$0xff]  ;;  %v1366_v52 = vpack.c.bf16 %v591_v45, %v589_v44  ;;  %v593_v56 = vld [vmem:[#allocation2 + $0x3a8] sm:$0xff] }
  0x7c   : > { %1463 = vmatprep.subr.bf16.mxu1 %v1462_v8  ;;  %v577_v8 = vld [vmem:[#allocation2 + $0x328] sm:$0xff]  ;;  %v1352_v13 = vpack.c.bf16 %v574_v6, %v572_v5  ;;  %v588_v53 = vld [vmem:[#allocation2 + $0x380] sm:$0xff]  ;;  %v599_v6 = vld [vmem:[#allocation2 + $0x3d8] sm:$0xff] }
  0x7d   : > { %1329 = vmatpush1.bf16.msra.mxu0 %v1328_v62  ;;  %v700_v62 = vld [vmem:[#allocation2 + $0x700] sm:$0xff]  ;;  %v1354_v16 = vpack.c.bf16 %v579_v9, %v577_v8  ;;  %v597_v5 = vld [vmem:[#allocation2 + $0x3c8] sm:$0xff]  ;;  %v726_v9 = vld [vmem:[#allocation2 + $0x7d0] sm:$0xff] }
  0x7e   : > { %1331 = vmatprep.subr.bf16.mxu0 %v1330_v2  ;;  %v705_v2 = vld [vmem:[#allocation2 + $0x728] sm:$0xff]  ;;  %v1480_v7 = vpack.c.bf16 %v702_v63, %v700_v62  ;;  %v727_v63 = vld [vmem:[#allocation2 + $0x7d8] sm:$0xff]  ;;  %v724_v8 = vld [vmem:[#allocation2 + $0x7c0] sm:$0xff] }
  0x7f   : > { %1465 = vmatpush1.bf16.msra.mxu1 %v1464_v17  ;;  %v1482_v10 = vpack.c.bf16 %v707_v3, %v705_v2  ;;  %v576_v17 = vld [vmem:[#allocation2 + $0x320] sm:$0xff]  ;;  %v725_v62 = vld [vmem:[#allocation2 + $0x7c8] sm:$0xff]  ;;  %v594_v3 = vld [vmem:[#allocation2 + $0x3b0] sm:$0xff] }
  0x80   : > { %1467 = vmatprep.subr.bf16.mxu1 %v1466_v20  ;;  %v581_v20 = vld [vmem:[#allocation2 + $0x348] sm:$0xff]  ;;  %v1356_v25 = vpack.c.bf16 %v578_v18, %v576_v17  ;;  %v592_v2 = vld [vmem:[#allocation2 + $0x3a0] sm:$0xff]  ;;  %v603_v18 = vld [vmem:[#allocation2 + $0x3f8] sm:$0xff] }
  0x81   : > { %1333 = vmatpush1.bf16.msra.mxu0 %v1332_v11  ;;  %v704_v11 = vld [vmem:[#allocation2 + $0x720] sm:$0xff]  ;;  %v1358_v28 = vpack.c.bf16 %v583_v21, %v581_v20  ;;  %v601_v17 = vld [vmem:[#allocation2 + $0x3e8] sm:$0xff]  ;;  %v730_v21 = vld [vmem:[#allocation2 + $0x7f0] sm:$0xff] }
  0x82   : > { %1335 = vmatprep.subr.bf16.mxu0 %v1334_v14  ;;  %v709_v14 = vld [vmem:[#allocation2 + $0x748] sm:$0xff]  ;;  %v1484_v19 = vpack.c.bf16 %v706_v12, %v704_v11  ;;  %v731_v12 = vld [vmem:[#allocation2 + $0x7f8] sm:$0xff]  ;;  %v728_v20 = vld [vmem:[#allocation2 + $0x7e0] sm:$0xff] }
  0x83   : > { %1469 = vmatpush1.bf16.msra.mxu1 %v1468_v29  ;;  %v1486_v22 = vpack.c.bf16 %v711_v15, %v709_v14  ;;  %v580_v29 = vld [vmem:[#allocation2 + $0x340] sm:$0xff]  ;;  %v729_v11 = vld [vmem:[#allocation2 + $0x7e8] sm:$0xff]  ;;  %v598_v15 = vld [vmem:[#allocation2 + $0x3d0] sm:$0xff] }
  0x84   : > { %1471 = vmatprep.subr.bf16.mxu1 %v1470_v32  ;;  %v585_v32 = vld [vmem:[#allocation2 + $0x368] sm:$0xff]  ;;  %v1360_v37 = vpack.c.bf16 %v582_v30, %v580_v29  ;;  %v596_v14 = vld [vmem:[#allocation2 + $0x3c0] sm:$0xff]  ;;  %v462_v29 = vld [vmem:[%s1696_s12 + $0x10] sm:$0xff] }
  0x85   : > { %1337 = vmatpush1.bf16.msra.mxu0 %v1336_v23  ;;  %v708_v23 = vld [vmem:[#allocation2 + $0x740] sm:$0xff]  ;;  %v1362_v40 = vpack.c.bf16 %v587_v33, %v585_v32 }
  0x86   : > { %1339 = vmatprep.subr.bf16.mxu0 %v1338_v26  ;;  %v713_v26 = vld [vmem:[#allocation2 + $0x768] sm:$0xff]  ;;  %v1488_v31 = vpack.c.bf16 %v710_v24, %v708_v23  ;;  %v1378_v23 = vpack.c.bf16 %v603_v18, %v601_v17  ;;  %v600_v24 = vld [vmem:[#allocation2 + $0x3e0] sm:$0xff] }
  0x87   : > { %1473 = vmatpush1.bf16.msra.mxu1 %v1472_v42  ;;  %v1490_v34 = vpack.c.bf16 %v715_v27, %v713_v26  ;;  %v586_v42 = vld [vmem:[#allocation2 + $0x370] sm:$0xff]  ;;  %v1508_v26 = vpack.c.bf16 %v730_v21, %v728_v20 }
  0x88   : > { %1475 = vmatprep.subr.bf16.mxu1 %v1474_v46  ;;  %v1364_v49 = vpack.c.bf16 %v586_v42, %v584_v41  ;;  %v466_v27 = vld [vmem:[%s1696_s12 + $0x30] sm:$0xff] }
  0x89   : > { %1341 = vmatpush1.bf16.msra.mxu0 %v1340_v35  ;;  %v712_v35 = vld [vmem:[#allocation2 + $0x760] sm:$0xff]  ;;  %v474_v30 = vmax.f32 %v466_v27, 0.0 }
  0x8a   : > { %1343 = vmatprep.subr.bf16.mxu0 %v1342_v38  ;;  %v717_v38 = vld [vmem:[#allocation2 + $0x788] sm:$0xff]  ;;  %v1492_v43 = vpack.c.bf16 %v714_v36, %v712_v35 }
  0x8b   : > { %1477 = vmatpush1.bf16.msra.mxu1 %v1476_v58  ;;  %v1494_v46 = vpack.c.bf16 %v719_v39, %v717_v38 }
  0x8c   : > { %1479 = vmatprep.subr.bf16.mxu1 %v1478_v61  ;;  %v1368_v61 = vpack.c.bf16 %v590_v54, %v588_v53 }
  0x8d   : > { %1345 = vmatpush1.bf16.msra.mxu0 %v1344_v51  ;;  %v723_v51 = vld [vmem:[#allocation2 + $0x7b8] sm:$0xff] }
  0x8e   : > { %1347 = vmatprep.subr.bf16.mxu0 %v1346_v55  ;;  %v1496_v55 = vpack.c.bf16 %v718_v48, %v716_v47  ;;  %v1498_v58 = vpack.c.bf16 %v723_v51, %v721_v50  ;;  %v1017_v50 = vld [vmem:[%s1751_s5 + $0x8] sm:$0xff] }
  0x8f   : > { %1481 = vmatpush1.bf16.msra.mxu1 %v1480_v7  ;;  %v1502_v7 = vpack.c.bf16 %v727_v63, %v725_v62 }
  0x90   : > { %1483 = vmatprep.subr.bf16.mxu1 %v1482_v10  ;;  %v1372_v10 = vpack.c.bf16 %v594_v3, %v592_v2 }
  0x91   : > { %1349 = vmatpush1.bf16.msra.mxu0 %v1348_v1  ;;  %v1370_v1 = vpack.c.bf16 %v595_v57, %v593_v56 }
  0x92   : > { %1351 = vmatprep.subr.bf16.mxu0 %v1350_v4  ;;  %v1500_v4 = vpack.c.bf16 %v722_v60, %v720_v59 }
  0x93   : > { %1485 = vmatpush1.bf16.msra.mxu1 %v1484_v19  ;;  %v1506_v19 = vpack.c.bf16 %v731_v12, %v729_v11 }
  0x94   : > { %1487 = vmatprep.subr.bf16.mxu1 %v1486_v22  ;;  %v1376_v22 = vpack.c.bf16 %v598_v15, %v596_v14 }
  0x95   : > { %1353 = vmatpush1.bf16.msra.mxu0 %v1352_v13  ;;  %v1374_v13 = vpack.c.bf16 %v599_v6, %v597_v5 }
  0x96   : > { %1355 = vmatprep.subr.bf16.mxu0 %v1354_v16  ;;  %v1504_v16 = vpack.c.bf16 %v726_v9, %v724_v8 }
  0x97   : > { %1489 = vmatpush1.bf16.msra.mxu1 %v1488_v31  ;;  %v470_v31 = vmax.f32 %v462_v29, 0.0 }
  0x98   : > { %1491 = vmatprep.subr.bf16.mxu1 %v1490_v34 }
  0x99   : > { %1357 = vmatpush1.bf16.msra.mxu0 %v1356_v25  ;;  %v602_v25 = vld [vmem:[#allocation2 + $0x3f0] sm:$0xff] }
  0x9a   : > { %1359 = vmatprep.subr.bf16.mxu0 %v1358_v28  ;;  %v1380_v28 = vpack.c.bf16 %v602_v25, %v600_v24 }
  0x9b   : > { %1493 = vmatpush1.bf16.msra.mxu1 %v1492_v43 }
  0x9c   : > { %1495 = vmatprep.subr.bf16.mxu1 %v1494_v46 }
  0x9d   : > { %1361 = vmatpush1.bf16.msra.mxu0 %v1360_v37  ;;  %v1018_v37 = vld [vmem:[%s1752_s6] sm:$0xff] }
  0x9e   : > { %1363 = vmatprep.subr.bf16.mxu0 %v1362_v40  ;;  %1022 = vperm.xlu1 %1542, %v1018_v37  }
  0x9f   : > { %1497 = vmatpush1.bf16.msra.mxu1 %v1496_v55 }
  0xa0   : > { %1499 = vmatprep.subr.bf16.mxu1 %v1498_v58 }
  0xa1   : > { %1365 = vmatpush1.bf16.msra.mxu0 %v1364_v49  ;;  %v1016_v49 = vld [vmem:[%s1751_s5] sm:$0xff] }
  0xa2   : > { %1367 = vmatprep.subr.bf16.mxu0 %v1366_v52 }
  0xa3   : > { %1501 = vmatpush1.bf16.msra.mxu1 %v1500_v4 }
  0xa4   : > { %1503 = vmatprep.subr.bf16.mxu1 %v1502_v7 }
  0xa5   : > { %1369 = vmatpush1.bf16.msra.mxu0 %v1368_v61 }
  0xa6   : > { %1371 = vmatprep.subr.bf16.mxu0 %v1370_v1 }
  0xa7   : > { %1505 = vmatpush1.bf16.msra.mxu1 %v1504_v16 }
  0xa8   : > { %1507 = vmatprep.subr.bf16.mxu1 %v1506_v19 }
  0xa9   : > { %1373 = vmatpush1.bf16.msra.mxu0 %v1372_v10 }
  0xaa   : > { %1375 = vmatprep.subr.bf16.mxu0 %v1374_v13 }
  0xab   : > { %1509 = vmatpush1.bf16.msra.mxu1 %v1508_v26 }
  0xad   : > { %1377 = vmatpush1.bf16.msra.mxu0 %v1376_v22 }
  0xae   : > { %1379 = vmatprep.subr.bf16.mxu0 %v1378_v23  ;;  %1010 = vmatmul.mubr.f32.vlgmr.msra.gmra.mrb[0].mxu1 %v474_v30 }
  0xaf   : > { %1106 = vmatprep.mubr.f32.mxu1 %v1586_v0 }
  0xb1   : > { %1381 = vmatpush1.bf16.msra.mxu0 %v1380_v28 }
  0xb4   : > { %868 = vmatmul.mubr.f32.vlgmr.msra.gmra.mrb[4].mxu0 %v470_v31 }
  0xb5   : > { %1100 = vmatprep.mubr.f32.mxu0 %v1586_v0  ;;  %v1019_v0 = vld [vmem:[%s1752_s6 + $0x8] sm:$0xff] }
  0xb6   : > { %1027 = vperm.xlu1 %1542, %v1019_v0  }
  0xdd   : > { %v365_v32 = vpop.permute.xlu0 %364 }
  0xf9   : > { %v370_v38 = vpop.permute.xlu0 %369 }
 0x107   : > { %v445_v33 = vpop.f32.mrb[0].mxu0 }
 0x108   : > { %v446_v34 = vadd.f32 %v445_v33, %v365_v32  ;;  %v447_v35 = vpop.f32.mrb[1].mxu0 }
 0x109   : > { %v448_v36 = vadd.f32 %v447_v35, %v365_v32 }
 0x10a   : > { %456 = vst [vmem:[%s348_s22] sm:$0xff] %v446_v34 }
 0x10b   : > { %457 = vst [vmem:[%s348_s22 + $0x8] sm:$0xff] %v448_v36 }
 0x11d   : > { %v1023_v51 = vpop.permute.xlu1 %1022 }
 0x11f   : > { %v451_v39 = vpop.f32.mrb[2].mxu0 }
 0x120   : > { %v452_v40 = vadd.f32 %v451_v39, %v370_v38  ;;  %v453_v41 = vpop.f32.mrb[3].mxu0 }
 0x121   : > { %v454_v42 = vadd.f32 %v453_v41, %v370_v38 }
 0x122   : > { %458 = vst [vmem:[%s348_s22 + $0x10] sm:$0xff] %v452_v40 }
 0x123   : > { %459 = vst [vmem:[%s348_s22 + $0x18] sm:$0xff] %v454_v42 }
 0x135   : > { %v1028_v52 = vpop.permute.xlu1 %1027 }
 0x181   : > { %v1011_v43 = vpop.f32.mrb[0].mxu1 }
 0x182   : > { %v1013_v44 = vpop.f32.mrb[1].mxu1 }
 0x187   : > { %v869_v45 = vpop.f32.mrb[4].mxu0 }
 0x188   : > { %v1512_v46 = vadd.f32 %v1011_v43, %v869_v45  ;;  %v871_v47 = vpop.f32.mrb[5].mxu0 }
 0x189   : > { %v1513_v48 = vadd.f32 %v1013_v44, %v871_v47 }
 0x18b   : > { %1036 = vmatprep.subr.mxu0 %v1513_v48  ;;  %1510 = vmatprep.subr.mxu1 %v1513_v48 }
 0x18c   : > { %1037 = vmatpush1.msra.mxu0 %v1512_v46  ;;  %1511 = vmatpush1.msra.mxu1 %v1512_v46 }
 0x18d   : > { %1246 = vmatmul.mubr.msk.f32.vlgmr.msra.gmra.mrb[6].mxu0 %vm372_vm0, %v1016_v49  ;;  %1247 = vmatmul.mubr.msk.f32.vlgmr.msra.gmra.mrb[2].mxu1 %vm372_vm0, %v1017_v50 }
 0x260   : > { %v1102_v53 = vpop.f32.mrb[6].mxu0  ;;  %v1108_v54 = vpop.f32.mrb[2].mxu1 }
 0x261   : > { %v1103_v55 = vadd.f32 %v1102_v53, %v1023_v51  ;;  %v1109_v56 = vadd.f32 %v1108_v54, %v1028_v52  ;;  %v1104_v57 = vpop.f32.mrb[7].mxu0  ;;  %v1110_v58 = vpop.f32.mrb[3].mxu1 }
 0x262   : > { %v1105_v59 = vadd.f32 %v1104_v57, %v1023_v51  ;;  %v1111_v60 = vadd.f32 %v1110_v58, %v1028_v52 }
 0x263   : > { %1113 = vst [vmem:[%s353_s13] sm:$0xff] %v1103_v55  ;;  %1115 = vst [vmem:[%s353_s13 + $0x10] sm:$0xff] %v1109_v56 }
 0x264   : > { %1114 = vst [vmem:[%s353_s13 + $0x8] sm:$0xff] %v1105_v59  ;;  %1116 = vst [vmem:[%s353_s13 + $0x18] sm:$0xff] %v1111_v60 }
 0x265 PF: > { %s20_s27 = sadd.s32 1, %s1581_s27  }
 0x266   : > { %p17_p3 = scmp.ge.s32.totalorder %s20_s27, 4  }
 0x268   :  { %19 = sbr.rel (!%p17_p3) target bundleno = 1 (0x1), region = 98 }
 0x26f   :  { %1154 = vsyncpa [#allocation3], 1 }
 0x270   :  { %1156 = vsyncpa [#allocation3 + $0x1], 1 }

</bundles_post_ra>
